<compile_context>
chip_gen: v5e
topology: v5e:2x2
jax: 0.10.0
libtpu: 0.0.40
codegen_flags: <defaults>
</compile_context>

<pallas_src>
import jax
import jax.numpy as jnp
from jax.experimental import pallas as pl
from jax.experimental.pallas import tpu as pltpu

NEG_SLOPE = 0.2
NEG_PAD = -1e9          # logit sentinel for padded edges (never influences the max)


def _rgat_kernel(src_e_ref, dst_pe_ref, adj_ref, wsrc_ref, bias_ref,
                 out_ref, numer_ref, denom_ref, cmax_ref):
    # grid = (hd tiles [parallel], node tiles [parallel],
    #         relations [arbitrary], edge chunks [arbitrary])
    r = pl.program_id(2)
    e = pl.program_id(3)
    n_e = pl.num_programs(3)

    # --- once per (hd tile, node tile, relation): reset softmax accumulators ---
    @pl.when(e == 0)
    def _():
        numer_ref[...] = jnp.zeros_like(numer_ref)
        denom_ref[...] = jnp.zeros_like(denom_ref)
        cmax_ref[...] = jnp.full_like(cmax_ref, -jnp.inf)

    # --- first visit of this output block: seed with the layer bias ---
    @pl.when(jnp.logical_and(r == 0, e == 0))
    def _():
        out_ref[...] = jnp.broadcast_to(bias_ref[...], out_ref.shape)

    adj = adj_ref[0]                  # [Nt, EC]   one-hot dst assignment (bf16 0/1)
    src_e = src_e_ref[0]              # [EC, 2F]   (src || edge) features, bf16

    # fc_src message projection for this edge chunk (bf16 x bf16, f32 MXU accumulation)
    m = jnp.dot(src_e, wsrc_ref[0], preferred_element_type=jnp.float32)     # [EC, HDt]

    # e_add_v with the destination projection streamed per edge (precomputed in wrapper)
    logits = m + dst_pe_ref[0].astype(jnp.float32)
    logits = jnp.where(logits >= 0, logits, NEG_SLOPE * logits)             # LeakyReLU

    # Online (flash-style) softmax over the edge axis, per output column. A per-column
    # running max replaces DGL's per-destination max; the constant cancels in
    # numer/denom (denom==0 is guarded at the end).
    # TODO(synk): for pathological logit spreads (>~80) a per-destination max is safer.
    cmax_old = cmax_ref[...]                                                # [1, HDt]
    cmax_new = jnp.maximum(cmax_old, jnp.max(logits, axis=0, keepdims=True))
    rescale = jnp.exp(cmax_old - cmax_new)                                  # [1, HDt]
    ex = jnp.exp(logits - cmax_new)                                         # [EC, HDt]

    # single bf16 cast of m / ex, reused below (trims the f32 temporary chain)
    m_bf = m.astype(jnp.bfloat16)
    ex_bf = ex.astype(jnp.bfloat16)

    # segment sums as one-hot matmuls (bf16 operands, f32 MXU accumulation)
    numer_ref[...] = numer_ref[...] * rescale + jnp.dot(
        adj, ex_bf * m_bf, preferred_element_type=jnp.float32)
    denom_ref[...] = denom_ref[...] * rescale + jnp.dot(
        adj, ex_bf, preferred_element_type=jnp.float32)
    cmax_ref[...] = cmax_new

    # --- last edge chunk of this relation: ft = numer/denom, accumulate over r ---
    @pl.when(e == n_e - 1)
    def _():
        denom = denom_ref[...]
        has_edge = denom > 0.0                      # dst nodes with no in-edges -> 0
        inv = pl.reciprocal(jnp.where(has_edge, denom, 1.0), approx=True)
        out_ref[...] += jnp.where(has_edge, numer_ref[...] * inv, 0.0)


def _round_up(x, m):
    return (x + m - 1) // m * m


def rgat_layer_forward(n_h, e_hs, src_idx, dst_idx, wsrc, wdst, h_bias, *,
                       edge_tile=1024, node_tile=1024, hd_tile=256):
    """RelationalAttLayer forward.

    n_h:     [N, F]      node features (same node type as src and dst)
    e_hs:    [R, E, F]   per-relation edge features
    src_idx: [R, E]      source node id per edge
    dst_idx: [R, E]      destination node id per edge
    wsrc:    [R, 2F, HD] fc_src weight (stored transposed, x @ W layout)
    wdst:    [R, F, HD]  fc_dst weight (stored transposed)
    h_bias:  [HD]        outer layer bias
    returns  [N, HD]     float32
    """
    assert edge_tile % 128 == 0 and hd_tile % 128 == 0 and node_tile % 8 == 0
    R, E, F = e_hs.shape
    N, Fn = n_h.shape
    assert Fn == F
    HD = wsrc.shape[-1]
    mmdt = jnp.bfloat16     # MXU operand dtype (accumulation stays f32 in-kernel)

    # ---- tile sizes, clamped for small problems ----
    ec = min(edge_tile, _round_up(E, 128))
    Ep = _round_up(E, ec)
    nt = min(node_tile, _round_up(N, 8))
    Np = _round_up(N, nt)
    hdt = min(hd_tile, _round_up(HD, 128))
    HDp = _round_up(HD, hdt)
    F2 = 2 * F

    # ---- plain-JAX glue: gathers, concat, per-edge dst projection, one-hot adjacency ----
    # TODO(synk): for very large N/E replace the dense one-hot adjacency with a
    # scalar-prefetched (SMEM) dst_idx + in-kernel gather/scatter sparse path.
    src_e = jnp.concatenate(
        [n_h[src_idx.reshape(-1)].reshape(R, E, F), e_hs], axis=-1).astype(mmdt)
    src_e = jnp.pad(src_e, ((0, 0), (0, Ep - E), (0, 0)))

    wsrc_p = jnp.pad(wsrc, ((0, 0), (0, 0), (0, HDp - HD))).astype(mmdt)
    wdst_p = jnp.pad(wdst, ((0, 0), (0, 0), (0, HDp - HD))).astype(mmdt)

    # per-edge destination projection (fc_dst then gather), streamed to the kernel so no
    # N-sized VMEM buffer and no lhs-transposed dot_general gather is needed in-kernel.
    dst_proj = jnp.einsum("nf,rfh->rnh", n_h.astype(mmdt), wdst_p,
                          preferred_element_type=jnp.float32).astype(mmdt)   # [R,N,HDp]
    dst_pe = dst_proj[jnp.arange(R)[:, None], dst_idx]                       # [R,E,HDp]
    # padded edges get a hugely negative projection -> exp()==0, and the running column
    # max is never dragged up by padding rows.
    dst_pe = jnp.pad(dst_pe, ((0, 0), (0, Ep - E), (0, 0)), constant_values=NEG_PAD)

    # node-major one-hot adjacency (0/1 exact in bf16); padded edge columns / padded
    # node rows are zero so they never contribute to numer/denom.
    adj = (dst_idx[:, None, :] == jnp.arange(Np)[None, :, None]).astype(mmdt)  # [R,Np,E]
    adj = jnp.pad(adj, ((0, 0), (0, 0), (0, Ep - E)))

    bias_p = jnp.pad(h_bias, (0, HDp - HD)).reshape(1, HDp).astype(jnp.float32)

    grid = (HDp // hdt, Np // nt, R, Ep // ec)

    # VMEM budget (double-buffered inputs/outputs + scratch + f32 temporaries), with
    # headroom; the scoped defaults (16/32 MiB) are often too small for large tiles.
    est = (2 * (nt * ec * 2 + ec * F2 * 2 + ec * hdt * 2 + F2 * hdt * 2 + hdt * 4
                + nt * hdt * 4)
           + (2 * nt * hdt + hdt) * 4
           + 5 * ec * hdt * 4)
    vmem_limit = int(min(max(est * 1.5, 32 * 1024 * 1024), 100 * 1024 * 1024))

    steps = grid[0] * grid[1] * grid[2] * grid[3]
    flops = steps * (2 * ec * F2 * hdt + 4 * nt * ec * hdt + 8 * ec * hdt)
    transcendentals = steps * (ec * hdt + hdt)
    bytes_accessed = (steps * (nt * ec * 2 + ec * F2 * 2 + ec * hdt * 2
                               + F2 * hdt * 2 + hdt * 4)
                      + Np * HDp * 4)

    out = pl.pallas_call(
        _rgat_kernel,
        out_shape=jax.ShapeDtypeStruct((Np, HDp), jnp.float32),
        grid_spec=pltpu.PrefetchScalarGridSpec(
            num_scalar_prefetch=0,
            grid=grid,
            in_specs=[
                pl.BlockSpec((1, ec, F2), lambda h, n, r, e: (r, e, 0)),    # src||edge
                pl.BlockSpec((1, ec, hdt), lambda h, n, r, e: (r, e, h)),   # dst proj / edge
                pl.BlockSpec((1, nt, ec), lambda h, n, r, e: (r, n, e)),    # adjacency
                pl.BlockSpec((1, F2, hdt), lambda h, n, r, e: (r, 0, h)),   # Wsrc
                pl.BlockSpec((1, hdt), lambda h, n, r, e: (0, h)),          # bias
            ],
            out_specs=pl.BlockSpec((nt, hdt), lambda h, n, r, e: (n, h)),
            scratch_shapes=[
                pltpu.VMEM((nt, hdt), jnp.float32),   # numerator accumulator
                pltpu.VMEM((nt, hdt), jnp.float32),   # denominator accumulator
                pltpu.VMEM((1, hdt), jnp.float32),    # running column max
            ],
        ),
        compiler_params=pltpu.CompilerParams(
            # TODO(synk): on v7x mark the node-tile axis pltpu.CORE_PARALLEL to shard
            # across both TensorCores; plain "parallel" is kept here for portability.
            dimension_semantics=("parallel", "parallel", "arbitrary", "arbitrary"),
            vmem_limit_bytes=vmem_limit),
        cost_estimate=pl.CostEstimate(flops=int(flops),
                                      transcendentals=int(transcendentals),
                                      bytes_accessed=int(bytes_accessed)),
    )(src_e, dst_pe, adj, wsrc_p, bias_p)

    # TODO(synk): on v7x experiment with shipping the adjacency in fp8 (0/1 exact) to
    # halve the dominant HBM stream if Mosaic accepts mixed fp8 x bf16 MXU operands.
    return out[:N, :HD]


def reference(n_h, e_hs, src_idx, dst_idx, wsrc, wdst, h_bias,
              mm_dtype=jnp.float32):
    """Pure-JAX reference of the DGL/PyTorch semantics (segment softmax).

    mm_dtype=float32 is the exact f32 spec; mm_dtype=bfloat16 mirrors the kernel's bf16
    MXU operands (f32 accumulation) for a tight numerical comparison.
    """
    def c(x):
        return x.astype(mm_dtype).astype(jnp.float32)

    R = wsrc.shape[0]
    N = n_h.shape[0]
    HD = wsrc.shape[-1]
    out = jnp.zeros((N, HD), jnp.float32)
    for r in range(R):
        x = jnp.concatenate([n_h[src_idx[r]], e_hs[r]], axis=-1)
        m = c(x) @ c(wsrc[r])                                       # fc_src
        dst_p = c(c(n_h) @ c(wdst[r]))                              # fc_dst
        logit = m + dst_p[dst_idx[r]]
        logit = jnp.where(logit >= 0, logit, NEG_SLOPE * logit)     # LeakyReLU(0.2)
        lmax = jnp.full((N, HD), -jnp.inf).at[dst_idx[r]].max(logit)
        ex = jnp.exp(logit - lmax[dst_idx[r]])
        denom = jnp.zeros((N, HD)).at[dst_idx[r]].add(c(ex))
        numer = jnp.zeros((N, HD)).at[dst_idx[r]].add(c(c(ex) * c(m)))
        out = out + jnp.where(denom > 0, numer / jnp.where(denom > 0, denom, 1.0), 0.0)
    return out + h_bias[None, :]


if __name__ == "__main__":
    # Small synthetic heterograph: one node type, R relation types over it. Shapes are
    # deliberately small, but chosen (with small tile overrides) to exercise edge
    # chunking, node tiling, multi-relation accumulation and padding.
    in_feat = 32            # F
    num_heads = 4
    out_feat = 32           # H*D total output width (head_dim = 8)
    HD = out_feat
    N = 24                  # nodes  (pads to Np=32 with node_tile=16)
    E = 300                 # edges per relation (pads to Ep=384 with edge_tile=128)
    R = 3                   # relations

    key = jax.random.PRNGKey(0)
    k_nh, k_eh, k_src, k_dst, k_wsrc, k_wdst = jax.random.split(key, 6)

    n_h = jax.random.normal(k_nh, (N, in_feat), jnp.float32)
    e_hs = jax.random.normal(k_eh, (R, E, in_feat), jnp.float32)
    src_idx = jax.random.randint(k_src, (R, E), 0, N)
    dst_idx = jax.random.randint(k_dst, (R, E), 0, N)

    # Parameters (xavier_normal with gain=sqrt(2) per module reset_parameters; weights
    # stored transposed [in, out] so the kernel computes x @ W).
    gain = 2.0 ** 0.5
    std_src = gain * (2.0 / (2 * in_feat + HD)) ** 0.5
    std_dst = gain * (2.0 / (in_feat + HD)) ** 0.5
    wsrc = std_src * jax.random.normal(k_wsrc, (R, 2 * in_feat, HD), jnp.float32)
    wdst = std_dst * jax.random.normal(k_wdst, (R, in_feat, HD), jnp.float32)
    h_bias = jnp.zeros((HD,), jnp.float32)        # nn.init.zeros_(self.h_bias)

    out = rgat_layer_forward(n_h, e_hs, src_idx, dst_idx, wsrc, wdst, h_bias,
                             edge_tile=128, node_tile=16, hd_tile=128)
    out = jax.block_until_ready(out)

    # Check against the pure-JAX module semantics, mirroring the kernel's bf16 MXU
    # operand precision (f32 accumulation) for a tight numerical comparison.
    ref = reference(n_h, e_hs, src_idx, dst_idx, wsrc, wdst, h_bias,
                    mm_dtype=jnp.bfloat16)
    assert out.shape == (N, HD)
    err = float(jnp.max(jnp.abs(out - ref)))
    assert jnp.allclose(out, ref, rtol=1e-2, atol=2e-2), f"max abs err {err}"

    # TODO(synk): feat_drop / attn_drop / layer dropout are 0.0 (inference identity);
    # stochastic dropout is not implemented in-kernel.
    print("KERNEL_OK")
</pallas_src>

<mosaic_0001>
module attributes {stable_mosaic.version = 11 : i64} {
  func.func @_rgat_kernel(%arg0: i32, %arg1: i32, %arg2: i32, %arg3: i32, %arg4: memref<1x128x64xbf16, #tpu.memory_space<vmem>>, %arg5: memref<1x128x128xbf16, #tpu.memory_space<vmem>>, %arg6: memref<1x16x128xbf16, #tpu.memory_space<vmem>>, %arg7: memref<1x64x128xbf16, #tpu.memory_space<vmem>>, %arg8: memref<1x128xf32, #tpu.memory_space<vmem>>, %arg9: memref<16x128xf32, #tpu.memory_space<vmem>>, %arg10: memref<16x128xf32, #tpu.memory_space<vmem>>, %arg11: memref<16x128xf32, #tpu.memory_space<vmem>>, %arg12: memref<1x128xf32, #tpu.memory_space<vmem>>) attributes {dimension_semantics = [#tpu.dimension_semantics<parallel>, #tpu.dimension_semantics<parallel>, #tpu.dimension_semantics<arbitrary>, #tpu.dimension_semantics<arbitrary>], iteration_bounds = array<i64: 1, 2, 3, 3>, scalar_prefetch = 0 : i64, scratch_operands = 3 : i64, tpu.core_type = #tpu.core_type<tc>, window_params = [{transform_indices = @transform_0, window_bounds = array<i64: 1, 128, 64>}, {transform_indices = @transform_1, window_bounds = array<i64: 1, 128, 128>}, {transform_indices = @transform_2, window_bounds = array<i64: 1, 16, 128>}, {transform_indices = @transform_3, window_bounds = array<i64: 1, 64, 128>}, {transform_indices = @transform_4, window_bounds = array<i64: 1, 128>}, {transform_indices = @transform_5, window_bounds = array<i64: 16, 128>}]} {
    %c0_i32 = arith.constant 0 : i32
    %0 = arith.cmpi eq, %arg3, %c0_i32 : i32
    %1 = arith.extui %0 : i1 to i32
    %c0_i32_0 = arith.constant 0 : i32
    %2 = arith.cmpi ne, %1, %c0_i32_0 : i32
    scf.if %2 {
      %cst_33 = arith.constant 0.000000e+00 : f32
      %52 = vector.broadcast %cst_33 : f32 to vector<16x128xf32>
      %c0_34 = arith.constant 0 : index
      %c0_35 = arith.constant 0 : index
      %53 = vector.load %arg10[%c0_34, %c0_35] : memref<16x128xf32, #tpu.memory_space<vmem>>, vector<16x128xf32>
      tpu.vector_store %arg10[%c0_34, %c0_35], %52 {strides = array<i32>} : memref<16x128xf32, #tpu.memory_space<vmem>>, vector<16x128xf32>,
      %cst_36 = arith.constant 0.000000e+00 : f32
      %54 = vector.broadcast %cst_36 : f32 to vector<16x128xf32>
      %c0_37 = arith.constant 0 : index
      %c0_38 = arith.constant 0 : index
      %55 = vector.load %arg11[%c0_37, %c0_38] : memref<16x128xf32, #tpu.memory_space<vmem>>, vector<16x128xf32>
      tpu.vector_store %arg11[%c0_37, %c0_38], %54 {strides = array<i32>} : memref<16x128xf32, #tpu.memory_space<vmem>>, vector<16x128xf32>,
      %cst_39 = arith.constant 0xFF800000 : f32
      %56 = vector.broadcast %cst_39 : f32 to vector<1x128xf32>
      %c0_40 = arith.constant 0 : index
      %c0_41 = arith.constant 0 : index
      %57 = vector.load %arg12[%c0_40, %c0_41] : memref<1x128xf32, #tpu.memory_space<vmem>>, vector<1x128xf32>
      tpu.vector_store %arg12[%c0_40, %c0_41], %56 {strides = array<i32>} : memref<1x128xf32, #tpu.memory_space<vmem>>, vector<1x128xf32>,
    } else {
    }
    %c0_i32_1 = arith.constant 0 : i32
    %3 = arith.cmpi eq, %arg2, %c0_i32_1 : i32
    %c0_i32_2 = arith.constant 0 : i32
    %4 = arith.cmpi eq, %arg3, %c0_i32_2 : i32
    %5 = arith.andi %3, %4 : i1
    %6 = arith.extui %5 : i1 to i32
    %c0_i32_3 = arith.constant 0 : i32
    %7 = arith.cmpi ne, %6, %c0_i32_3 : i32
    scf.if %7 {
      %c0_33 = arith.constant 0 : index
      %c0_34 = arith.constant 0 : index
      %52 = vector.load %arg8[%c0_33, %c0_34] : memref<1x128xf32, #tpu.memory_space<vmem>>, vector<1x128xf32>
      %53 = vector.shape_cast %52 : vector<1x128xf32> to vector<1x128xf32>
      %54 = vector.broadcast %53 : vector<1x128xf32> to vector<16x128xf32>
      %c0_35 = arith.constant 0 : index
      %c0_36 = arith.constant 0 : index
      %55 = vector.load %arg9[%c0_35, %c0_36] : memref<16x128xf32, #tpu.memory_space<vmem>>, vector<16x128xf32>
      tpu.vector_store %arg9[%c0_35, %c0_36], %54 {strides = array<i32>} : memref<16x128xf32, #tpu.memory_space<vmem>>, vector<16x128xf32>,
    } else {
    }
    %c0 = arith.constant 0 : index
    %c0_4 = arith.constant 0 : index
    %c0_5 = arith.constant 0 : index
    %8 = vector.load %arg6[%c0, %c0_4, %c0_5] : memref<1x16x128xbf16, #tpu.memory_space<vmem>>, vector<1x16x128xbf16>
    %9 = vector.shape_cast %8 : vector<1x16x128xbf16> to vector<16x128xbf16>
    %c0_6 = arith.constant 0 : index
    %c0_7 = arith.constant 0 : index
    %c0_8 = arith.constant 0 : index
    %10 = vector.load %arg4[%c0_6, %c0_7, %c0_8] : memref<1x128x64xbf16, #tpu.memory_space<vmem>>, vector<1x128x64xbf16>
    %11 = vector.shape_cast %10 : vector<1x128x64xbf16> to vector<128x64xbf16>
    %c0_9 = arith.constant 0 : index
    %c0_10 = arith.constant 0 : index
    %c0_11 = arith.constant 0 : index
    %12 = vector.load %arg7[%c0_9, %c0_10, %c0_11] : memref<1x64x128xbf16, #tpu.memory_space<vmem>>, vector<1x64x128xbf16>
    %13 = vector.shape_cast %12 : vector<1x64x128xbf16> to vector<64x128xbf16>
    %cst = arith.constant dense<0.000000e+00> : vector<128x128xf32>
    %14 = tpu.matmul %11, %13, %cst {dimension_numbers = #tpu.dot_dimension_numbers<[1], [0], [0], [1], [0, 0, 1, 1], [], []>} : vector<128x64xbf16>, vector<64x128xbf16>, vector<128x128xf32> -> vector<128x128xf32>
    %c0_12 = arith.constant 0 : index
    %c0_13 = arith.constant 0 : index
    %c0_14 = arith.constant 0 : index
    %15 = vector.load %arg5[%c0_12, %c0_13, %c0_14] : memref<1x128x128xbf16, #tpu.memory_space<vmem>>, vector<1x128x128xbf16>
    %16 = vector.shape_cast %15 : vector<1x128x128xbf16> to vector<128x128xbf16>
    %17 = arith.extf %16 : vector<128x128xbf16> to vector<128x128xf32>
    %18 = arith.addf %14, %17 : vector<128x128xf32>
    %cst_15 = arith.constant 0.000000e+00 : f32
    %19 = vector.broadcast %cst_15 : f32 to vector<128x128xf32>
    %20 = arith.cmpf oge, %18, %19 : vector<128x128xf32>
    %cst_16 = arith.constant 2.000000e-01 : f32
    %21 = vector.broadcast %cst_16 : f32 to vector<128x128xf32>
    %22 = arith.mulf %21, %18 : vector<128x128xf32>
    %23 = arith.select %20, %18, %22 : vector<128x128xi1>, vector<128x128xf32>
    %c0_17 = arith.constant 0 : index
    %c0_18 = arith.constant 0 : index
    %24 = vector.load %arg12[%c0_17, %c0_18] : memref<1x128xf32, #tpu.memory_space<vmem>>, vector<1x128xf32>
    %cst_19 = arith.constant dense<0xFF800000> : vector<128xf32>
    %25 = vector.multi_reduction <maximumf>, %23, %cst_19 [0] : vector<128x128xf32> to vector<128xf32>
    %26 = vector.shape_cast %25 : vector<128xf32> to vector<1x128xf32>
    %27 = arith.maximumf %24, %26 : vector<1x128xf32>
    %28 = arith.subf %24, %27 : vector<1x128xf32>
    %29 = math.exp %28 : vector<1x128xf32>
    %30 = vector.broadcast %27 : vector<1x128xf32> to vector<128x128xf32>
    %31 = arith.subf %23, %30 : vector<128x128xf32>
    %32 = math.exp %31 : vector<128x128xf32>
    %33 = arith.truncf %14 : vector<128x128xf32> to vector<128x128xbf16>
    %34 = arith.truncf %32 : vector<128x128xf32> to vector<128x128xbf16>
    %c0_20 = arith.constant 0 : index
    %c0_21 = arith.constant 0 : index
    %35 = vector.load %arg10[%c0_20, %c0_21] : memref<16x128xf32, #tpu.memory_space<vmem>>, vector<16x128xf32>
    %36 = vector.broadcast %29 : vector<1x128xf32> to vector<16x128xf32>
    %37 = arith.mulf %35, %36 : vector<16x128xf32>
    %38 = arith.mulf %34, %33 : vector<128x128xbf16>
    %cst_22 = arith.constant dense<0.000000e+00> : vector<16x128xf32>
    %39 = tpu.matmul %9, %38, %cst_22 {dimension_numbers = #tpu.dot_dimension_numbers<[1], [0], [0], [1], [0, 0, 1, 1], [], []>} : vector<16x128xbf16>, vector<128x128xbf16>, vector<16x128xf32> -> vector<16x128xf32>
    %40 = arith.addf %37, %39 : vector<16x128xf32>
    %c0_23 = arith.constant 0 : index
    %c0_24 = arith.constant 0 : index
    %41 = vector.load %arg10[%c0_23, %c0_24] : memref<16x128xf32, #tpu.memory_space<vmem>>, vector<16x128xf32>
    tpu.vector_store %arg10[%c0_23, %c0_24], %40 {strides = array<i32>} : memref<16x128xf32, #tpu.memory_space<vmem>>, vector<16x128xf32>,
    %c0_25 = arith.constant 0 : index
    %c0_26 = arith.constant 0 : index
    %42 = vector.load %arg11[%c0_25, %c0_26] : memref<16x128xf32, #tpu.memory_space<vmem>>, vector<16x128xf32>
    %43 = vector.broadcast %29 : vector<1x128xf32> to vector<16x128xf32>
    %44 = arith.mulf %42, %43 : vector<16x128xf32>
    %cst_27 = arith.constant dense<0.000000e+00> : vector<16x128xf32>
    %45 = tpu.matmul %9, %34, %cst_27 {dimension_numbers = #tpu.dot_dimension_numbers<[1], [0], [0], [1], [0, 0, 1, 1], [], []>} : vector<16x128xbf16>, vector<128x128xbf16>, vector<16x128xf32> -> vector<16x128xf32>
    %46 = arith.addf %44, %45 : vector<16x128xf32>
    %c0_28 = arith.constant 0 : index
    %c0_29 = arith.constant 0 : index
    %47 = vector.load %arg11[%c0_28, %c0_29] : memref<16x128xf32, #tpu.memory_space<vmem>>, vector<16x128xf32>
    tpu.vector_store %arg11[%c0_28, %c0_29], %46 {strides = array<i32>} : memref<16x128xf32, #tpu.memory_space<vmem>>, vector<16x128xf32>,
    %c0_30 = arith.constant 0 : index
    %c0_31 = arith.constant 0 : index
    %48 = vector.load %arg12[%c0_30, %c0_31] : memref<1x128xf32, #tpu.memory_space<vmem>>, vector<1x128xf32>
    tpu.vector_store %arg12[%c0_30, %c0_31], %27 {strides = array<i32>} : memref<1x128xf32, #tpu.memory_space<vmem>>, vector<1x128xf32>,
    %c2_i32 = arith.constant 2 : i32
    %49 = arith.cmpi eq, %arg3, %c2_i32 : i32
    %50 = arith.extui %49 : i1 to i32
    %c0_i32_32 = arith.constant 0 : i32
    %51 = arith.cmpi ne, %50, %c0_i32_32 : i32
    scf.if %51 {
      %c0_33 = arith.constant 0 : index
      %c0_34 = arith.constant 0 : index
      %52 = vector.load %arg11[%c0_33, %c0_34] : memref<16x128xf32, #tpu.memory_space<vmem>>, vector<16x128xf32>
      %cst_35 = arith.constant 0.000000e+00 : f32
      %53 = vector.broadcast %cst_35 : f32 to vector<16x128xf32>
      %54 = arith.cmpf ogt, %52, %53 : vector<16x128xf32>
      %cst_36 = arith.constant 1.000000e+00 : f32
      %55 = vector.broadcast %cst_36 : f32 to vector<16x128xf32>
      %56 = arith.select %54, %52, %55 : vector<16x128xi1>, vector<16x128xf32>
      %57 = tpu.reciprocal %56 {approx = true} : vector<16x128xf32> -> vector<16x128xf32>
      %c0_37 = arith.constant 0 : index
      %c0_38 = arith.constant 0 : index
      %58 = vector.load %arg9[%c0_37, %c0_38] : memref<16x128xf32, #tpu.memory_space<vmem>>, vector<16x128xf32>
      %c0_39 = arith.constant 0 : index
      %c0_40 = arith.constant 0 : index
      %59 = vector.load %arg10[%c0_39, %c0_40] : memref<16x128xf32, #tpu.memory_space<vmem>>, vector<16x128xf32>
      %60 = arith.mulf %59, %57 : vector<16x128xf32>
      %cst_41 = arith.constant 0.000000e+00 : f32
      %61 = vector.broadcast %cst_41 : f32 to vector<16x128xf32>
      %62 = arith.select %54, %60, %61 : vector<16x128xi1>, vector<16x128xf32>
      %63 = arith.addf %58, %62 : vector<16x128xf32>
      %c0_42 = arith.constant 0 : index
      %c0_43 = arith.constant 0 : index
      %64 = vector.load %arg9[%c0_42, %c0_43] : memref<16x128xf32, #tpu.memory_space<vmem>>, vector<16x128xf32>
      tpu.vector_store %arg9[%c0_42, %c0_43], %63 {strides = array<i32>} : memref<16x128xf32, #tpu.memory_space<vmem>>, vector<16x128xf32>,
    } else {
    }
    return
  }
  func.func @transform_0(%arg0: i32, %arg1: i32, %arg2: i32, %arg3: i32) -> (i32, i32, i32) {
    %c0_i32 = arith.constant 0 : i32
    %c0_i32_0 = arith.constant 0 : i32
    return %arg2, %arg3, %c0_i32 : i32, i32, i32
  }
  func.func @transform_1(%arg0: i32, %arg1: i32, %arg2: i32, %arg3: i32) -> (i32, i32, i32) {
    %c0_i32 = arith.constant 0 : i32
    return %arg2, %arg3, %arg0 : i32, i32, i32
  }
  func.func @transform_2(%arg0: i32, %arg1: i32, %arg2: i32, %arg3: i32) -> (i32, i32, i32) {
    %c0_i32 = arith.constant 0 : i32
    return %arg2, %arg1, %arg3 : i32, i32, i32
  }
  func.func @transform_3(%arg0: i32, %arg1: i32, %arg2: i32, %arg3: i32) -> (i32, i32, i32) {
    %c0_i32 = arith.constant 0 : i32
    %c0_i32_0 = arith.constant 0 : i32
    return %arg2, %c0_i32, %arg0 : i32, i32, i32
  }
  func.func @transform_4(%arg0: i32, %arg1: i32, %arg2: i32, %arg3: i32) -> (i32, i32) {
    %c0_i32 = arith.constant 0 : i32
    %c0_i32_0 = arith.constant 0 : i32
    return %c0_i32, %arg0 : i32, i32
  }
  func.func @transform_5(%arg0: i32, %arg1: i32, %arg2: i32, %arg3: i32) -> (i32, i32) {
    %c0_i32 = arith.constant 0 : i32
    return %arg1, %arg0 : i32, i32
  }
}

</mosaic_0001>

<bundles_post_ra>
// kernel: tpu_custom_call.1
= control target key start
LH: loop header
LB: loop body
LE: loop exit
PB: predicated region body
PF: predicated region fallthrough
CT: control target
= control target key end

     0   :  { %s2061_s0 = inlined_call_operand.vmem [shape: bf16[3,384,64], index: 0, kind: input, shape index: {}]   ;;  %s2062_s1 = inlined_call_operand.vmem [shape: bf16[3,384,128], index: 1, kind: input, shape index: {}]   ;;  %s2063_s2 = inlined_call_operand.vmem [shape: bf16[3,32,384], index: 2, kind: input, shape index: {}]   ;;  %s2064_s3 = inlined_call_operand.vmem [shape: bf16[3,64,128], index: 3, kind: input, shape index: {}]   ;;  %s2065_s4 = inlined_call_operand.vmem [shape: f32[1,128], index: 4, kind: input, shape index: {}]   ;;  %s2066_s5 = inlined_call_operand.hbm [shape: f32[32,128], index: 5, kind: output, shape index: {}]  }
   0x1   :  { %2077 = sst [smem:[#allocation19_spill]] %s2063_s2 }
   0x2   :  { %2078 = sst [smem:[#allocation20_spill]] %s2066_s5 }
   0x3   :  { %10 = vsyncpa [#allocation7], 0 }
   0x4   :  { %12 = vsyncpa [#allocation7 + $0x1], 0  ;;  %s1647_s18 = smov 0   ;;  %s1649_s19 = smov 0  }
   0x5   :  { %s1651_s20 = smov 0   ;;  %s1653_s21 = smov 0  }
   0x6   :  { %s1655_s22 = smov 0   ;;  %s1657_s23 = smov 0  }
   0x7   :  { %s1659_s24 = smov 0   ;;  %s1661_s25 = smov 0  }
   0x8   :  { %s1663_s26 = smov 0   ;;  %s1665_s27 = smov 0  }
   0x9   :  { %s1667_s28 = smov 0   ;;  %s1669_s29 = smov 0  }
   0xa LB: > { %2079 = sst [smem:[#allocation9_spill]] %s1567_s18  ;;  %s33_s30 = sadd.s32 1, %s1599_s26  ;;  %s1611_s29 = sphi %s1669_s29, %s18_s29   ;;  %s1607_s28 = sphi %s1667_s28, %s2105_s28   ;;  %s1603_s27 = sphi %s1665_s27, %s2104_s27   ;;  %s1599_s26 = sphi %s1663_s26, %s2103_s26   ;;  %s1595_s25 = sphi %s1661_s25, %s2102_s25   ;;  %s1591_s24 = sphi %s1659_s24, %s2101_s24   ;;  %s1587_s23 = sphi %s1657_s23, %s2100_s23   ;;  %s1583_s22 = sphi %s1655_s22, %s2109_s22   ;;  %s1579_s21 = sphi %s1653_s21, %s2098_s21   ;;  %s1575_s20 = sphi %s1651_s20, %s2108_s20   ;;  %s1571_s19 = sphi %s1649_s19, %s2107_s19   ;;  %s1567_s18 = sphi %s1647_s18, %s2106_s18  }
   0xb   : > { %2080 = sst [smem:[#allocation10_spill]] %s1583_s22  ;;  %p34_p0 = scmp.ge.s32.totalorder %s33_s30, 3 }
   0xc   : > { %2081 = sst [smem:[#allocation11_spill]] %s1599_s26  ;;  %s36_s6 = sadd.s32 1, %s1603_s27 }
   0xd   : > { %2082 = sst [smem:[#allocation12_spill]] %s1603_s27  ;;  %s1189_s7 = sadd.s32 4294967295, %s1611_s29  }
   0xe   : > { %2083 = sst [smem:[#allocation13_spill]] %s1607_s28  ;;  %p120_p1 = scmp.ne.s32.totalorder %s1583_s22, %s1579_s21 }
   0xf   : > { %s2111_s30 = smov (%p34_p0, %s33_s30), 0  ;;  %s2113_s6 = smov (!%p34_p0, %s36_s6), %s1603_s27 }
  0x10   : > { %2084 = sst [smem:[#allocation14_spill]] %s2111_s30  ;;  %s1190_s8 = sadd.s32 4294967294, %s1611_s29  }
  0x11   : > { %p121_p2 = scmp.eq.s32.totalorder %s1611_s29, 0  ;;  %p38_p3 = scmp.ge.s32.totalorder %s2113_s6, 3 }
  0x12   : > { %s40_s9 = sadd.s32 1, %s1607_s28  ;;  %p205_p5 = scmp.ne.s32.totalorder %s1575_s20, %s1571_s19 }
  0x13   : > { %p1718_p4 = por %p121_p2, %p120_p1  ;;  %s2115_s6 = smov (%p38_p3, %s2113_s6), 0 }
  0x14   : > { %2086 = sst [smem:[#allocation15_spill]] %s2115_s6  ;;  %s2117_s9 = smov (!%p38_p3, %s40_s9), %s1607_s28 }
  0x15   : > { %s106_s11 = ssub.s32 %s1603_s27, %s2115_s6  ;;  %p206_p6 = scmp.eq.s32.totalorder %s1189_s7, 17 }
  0x16   : > { %p42_p7 = scmp.ge.s32.totalorder %s2117_s9, 2  ;;  %p211_p8 = scmp.ne.s32.totalorder %s1571_s19, %s1567_s18 }
  0x17   : > { %p1731_p9 = por %p206_p6, %p205_p5  ;;  %p212_p10 = scmp.eq.s32.totalorder %s1190_s8, 17 }
  0x18   : > { %s2119_s9 = smov (%p42_p7, %s2117_s9), 0  ;;  %s109_s13 = ssub.s32 %s1599_s26, %s2111_s30 }
  0x19   : > { %2088 = sst [smem:[#allocation16_spill]] %s2119_s9  ;;  %p1739_p11 = por %p212_p10, %p211_p8 }
  0x1a   : > { %s107_s15 = ssub.s32 %s1607_s28, %s2119_s9  ;;  %s195_s16 = sadd.s32 1, %s1575_s20 }
  0x1b   : > { %s108_s17 = sor.u32 %s107_s15, %s106_s11  ;;  %p193_p12 = scmp.eq.s32.totalorder %s107_s15, 0 }
  0x1c   : > { %s110_s7 = sor.u32 %s109_s13, %s108_s17  ;;  %s113_s6 = sadd.s32 1, %s1583_s22 }
  0x1d   : > { %p111_p13 = scmp.eq.s32.totalorder %s110_s7, 0  ;;  %p1193_p0 = scmp.ge.s32.totalorder %s1611_s29, 18 }
  0x1e   : > { %s1748_s18 = scalar_select %p193_p12, %s1575_s20, %s195_s16  }
  0x1f   : > { %s1751_s5 = scalar_select %p111_p13, %s1583_s22, %s113_s6  }
  0x20   : > { %2090 = sst [smem:[#allocation17_spill]] %s1748_s18  ;;  %234 = sbr.rel (%p1193_p0) target bundleno = 49 (0x31), region = 20 }
  0x21   : > { %2091 = sst [smem:[#allocation18_spill]] %s1751_s5 }
  0x25   : > { %266 = sbr.rel (!%p1718_p4) target bundleno = 49 (0x31), region = 32  ;;  %s268_s8 = sand.u32 (%p1718_p4), 1, %s1583_s22  }
  0x26   : > { %s1336_s11 = smul.u32 (%p1718_p4), 6, %s1607_s28  ;;  %s1194_s15 = sshll.u32 (%p1718_p4), %s268_s8, 3 }
  0x27   : > { %s1337_s13 = smul.u32 (%p1718_p4), 12, %s1603_s27  ;;  %s2092_s2 = sld [smem:[#allocation19_spill]] (%p1718_p4) }
  0x28   : > { %s273_s17 = sadd.s32 (%p1718_p4), %s1599_s26, %s1336_s11  ;;  %s270_s5 = scalar_lea.vmem (%p1718_p4), [#allocation5], %s1194_s15 }
  0x29   : > { %s275_s7 = sadd.s32 (%p1718_p4), %s1337_s13, %s273_s17 }
  0x2a   : > { %s1197_s16 = sshll.u32 %s275_s7, 2 }
  0x2d   : > { %s277_s30 = scalar_lea.vmem %s2092_s2, %s1197_s16 }
  0x2e   : > { %v294_v0 = vld [vmem:[%s277_s30] sm:$0xf]  ;;  %v296_v1 = vld [vmem:[%s277_s30 + $0xc] sm:$0xf] }
  0x2f   : > { %295 = vst [vmem:[%s270_s5] sm:$0xf] %v294_v0 }
  0x30   : > { %297 = vst [vmem:[%s270_s5 + $0x4] sm:$0xf] %v296_v1 }
  0x31 PF: > { %p1198_p1 = scmp.ge.s32.totalorder %s1611_s29, 1  ;;  %p335_p2 = scmp.lt.s32.totalorder %s1611_s29, 19 }
  0x33   : > { %p336_p3 = pnand %p1198_p1, %p335_p2 }
  0x34   : > { %s342_s9 = sand.u32 (!%p336_p3), 1, %s1579_s21   ;;  %s2073_s30 = sand.u32 (!%p336_p3), 1, %s1571_s19  }
  0x35   : > { %339 = sbr.rel (%p336_p3) target bundleno = 534 (0x216), region = 77  ;;  %s1767_s10 = sshll.u32 (!%p336_p3), %s342_s9, 3 }
  0x36   : > { %s1200_s5 = sshll.u32 (!%p336_p3), %s2073_s30, 4  ;;  %s1201_s8 = sshll.u32 (!%p336_p3), %s1587_s23, 4 }
  0x37   : > { %p402_p4 = scmp.lt.s32.totalorder (!%p336_p3), %s1591_s24, 2  ;;  %p404_p5 = scmp.lt.s32.totalorder (!%p336_p3), %s1201_s8, 47 }
  0x38   : > { %p438_p6 = scmp.eq.s32.totalorder (!%p336_p3), %s1587_s23, 0  ;;  %s344_s22 = scalar_lea.vmem (!%p336_p3), [#allocation5], %s1767_s10 }
  0x39   : > { %s1791_s18 = scalar_lea.vmem (!%p336_p3), [#allocation6], %s1200_s5  ;;  %p1207_p7 = scmp.ne.s32.totalorder (!%p336_p3), %s1587_s23, 0 }
  0x3a   : > { %s403_s11 = scalar_select %p402_p4, %s1591_s24, 2 }
  0x3b   : > { %s2121_s8 = smov (!%p404_p5, %s1201_s8), 47 }
  0x3c   : > { %s1338_s15 = smul.u32 48, %s403_s11  ;;  %s1274_s13 = sshll.u32 %s403_s11, 5 }
  0x3d   : > { %s1778_s16 = scalar_lea.vmem %s2064_s3, %s1274_s13  ;;  %441 = sbr.rel (%p1207_p7) target bundleno = 72 (0x48), region = 85 }
  0x3e   : > { %s407_s21 = sadd.s32 %s1338_s15, %s2121_s8 }
  0x3f   : > { %s1202_s6 = sshll.u32 %s407_s21, 2 }
  0x40   : > { %s1783_s28 = scalar_lea.vmem %s2061_s0, %s1202_s6  ;;  %s1788_s26 = scalar_lea.vmem %s2062_s1, %s1202_s6 }
  0x42   : > { %v1613_v2 = vmov 0.0   ;;  %v1614_v3 = vmov -inf  }
  0x43   : > { %442 = vst [vmem:[#allocation2] sm:$0xff] %v1613_v2 }
  0x44   : > { %443 = vst [vmem:[#allocation2 + $0x8] sm:$0xff] %v1613_v2 }
  0x45   : > { %444 = vst [vmem:[#allocation3 + $0x8] sm:$0xff] %v1613_v2 }
  0x46   : > { %445 = vst [vmem:[#allocation3] sm:$0xff] %v1613_v2 }
  0x47   : > { %446 = vst [vmem:[#allocation4] sm:$0x1] %v1614_v3 }
  0x48 PF: > { %p447_p8 = scmp.eq.s32.totalorder %s1591_s24, 0 }
  0x4a   : > { %p448_p10 = pnand %p447_p8, %p438_p6 }
  0x4c   : > { %451 = sbr.rel (%p448_p10) target bundleno = 84 (0x54), region = 89 }
  0x51   : > { %v1446_v4 = vld [vmem:[%s2065_s4] ss:$0 sm:$0xff] }
  0x52   : > { %456 = vst [vmem:[%s1791_s18] sm:$0xff] %v1446_v4 }
  0x53   : > { %457 = vst [vmem:[%s1791_s18 + $0x8] sm:$0xff] %v1446_v4 }
  0x54 PF: > { %v1287_v5 = vld [vmem:[%s1778_s16 + $0x18] sm:$0xff]  ;;  %v1286_v6 = vld [vmem:[%s1778_s16 + $0x10] sm:$0xff]  ;;  %v1285_v7 = vld [vmem:[%s1778_s16 + $0x8] sm:$0xff]  ;;  %vm548_vm0 = vcmask 523264   ;;  %p1268_p12 = scmp.ne.s32.totalorder %s1587_s23, 2 }
  0x55   : > { %577 = vmatpush.bf16.msra.mxu0 %v1287_v5  ;;  %1329 = vmatpush.bf16.msra.mxu3 %v1287_v5  ;;  %v1284_v8 = vld [vmem:[%s1778_s16] sm:$0xff]  ;;  %v1281_v10 = vld [vmem:[%s1783_s28 + $0x28] sm:$0xff]  ;;  %v1279_v11 = vld [vmem:[%s1783_s28 + $0x18] sm:$0xff] }
  0x56   : > { %1328 = vmatpush.bf16.msra.mxu1 %v1287_v5  ;;  %v1276_v9 = vld [vmem:[%s1783_s28] sm:$0xff]  ;;  %v1277_v12 = vld [vmem:[%s1783_s28 + $0x8] sm:$0xff]  ;;  %v1282_v13 = vld [vmem:[%s1783_s28 + $0x30] sm:$0xff] }
  0x57   : > { %v1280_v14 = vld [vmem:[%s1783_s28 + $0x20] sm:$0xff]  ;;  %v1278_v15 = vld [vmem:[%s1783_s28 + $0x10] sm:$0xff]  ;;  %v1283_v16 = vld [vmem:[%s1783_s28 + $0x38] sm:$0xff] }
  0x58   : > { %v1290_v24 = vld [vmem:[%s1788_s26] sm:$0xff]   ;;  %v1323_v27 = vld [vmem:[%s1788_s26 + $0x18] sm:$0xff]   ;;  %v1321_v29 = vld [vmem:[%s1788_s26 + $0x8] sm:$0xff]  }
  0x59   : > { %578 = vmatpush.bf16.msra.mxu0 %v1286_v6  ;;  %1331 = vmatpush.bf16.msra.mxu3 %v1286_v6  ;;  %v1291_v26 = vunpack.c.l.bf16 %v1290_v24  ;;  %v1303_v30 = vunpack.c.l.bf16 %v1323_v27  ;;  %v1322_v32 = vld [vmem:[%s1788_s26 + $0x10] sm:$0xff]   ;;  %v1325_v34 = vld [vmem:[%s1788_s26 + $0x28] sm:$0xff]   ;;  %v1292_v35 = vunpack.c.h.bf16 %v1290_v24  ;;  %v1295_v36 = vunpack.c.l.bf16 %v1321_v29  ;;  %v1324_v38 = vld [vmem:[%s1788_s26 + $0x20] sm:$0xff]  }
  0x5a   : > { %1330 = vmatpush.bf16.msra.mxu1 %v1286_v6  ;;  %v1304_v37 = vunpack.c.h.bf16 %v1323_v27  ;;  %v1299_v39 = vunpack.c.l.bf16 %v1322_v32  ;;  %v1311_v40 = vunpack.c.l.bf16 %v1325_v34  ;;  %v1326_v42 = vld [vmem:[%s1788_s26 + $0x30] sm:$0xff]   ;;  %v1296_v46 = vunpack.c.h.bf16 %v1321_v29  ;;  %v1851_v51 = vld [vmem:[%s1788_s26 + $0x38] sm:$0xff]  }
  0x5b   : > { %v1307_v49 = vunpack.c.l.bf16 %v1324_v38  ;;  %v1312_v52 = vunpack.c.h.bf16 %v1325_v34  ;;  %v1315_v53 = vunpack.c.l.bf16 %v1326_v42  ;;  %v1316_v54 = vunpack.c.h.bf16 %v1326_v42 }
  0x5c   : > { %v1308_v58 = vunpack.c.h.bf16 %v1324_v38  ;;  %v1319_v62 = vunpack.c.l.bf16 %v1851_v51  ;;  %v1300_v4 = vunpack.c.h.bf16 %v1322_v32 }
  0x5d   : > { %579 = vmatpush.bf16.msra.mxu0 %v1285_v7  ;;  %1333 = vmatpush.bf16.msra.mxu3 %v1285_v7 }
  0x5e   : > { %1332 = vmatpush.bf16.msra.mxu1 %v1285_v7 }
  0x61   : > { %580 = vmatpush.bf16.msra.mxu0 %v1284_v8  ;;  %1335 = vmatpush.bf16.msra.mxu3 %v1284_v8 }
  0x62   : > { %1334 = vmatpush.bf16.msra.mxu1 %v1284_v8 }
  0x64   : > { %1256 = vmatmul.msk.bf16.vlgmr.msra.gmra.mxu0 %vm548_vm0, %v1276_v9  ;;  %1261 = vmatmul.msk.bf16.vlgmr.msra.gmra.mxu3 %vm548_vm0, %v1281_v10 }
  0x65   : > { %1259 = vmatmul.msk.bf16.vlgmr.msra.gmra.mxu1 %vm548_vm0, %v1279_v11 }
  0x74   : > { %1257 = vmatmul.msk.bf16.gmra.mxu0 %vm548_vm0, %v1277_v12  ;;  %1262 = vmatmul.msk.bf16.gmra.mxu3 %vm548_vm0, %v1282_v13 }
  0x75   : > { %1260 = vmatmul.msk.bf16.gmra.mxu1 %vm548_vm0, %v1280_v14 }
  0x84   : > { %1258 = vmatmul.msk.bf16.gmra.mxu0 %vm548_vm0, %v1278_v15  ;;  %1263 = vmatmul.msk.bf16.gmra.mxu3 %vm548_vm0, %v1283_v16 }
  0xe1   : > { %v1814_v17 = vpop.f32.mrf.mxu0 }
  0xe2   : > { %v1818_v19 = vpop.f32.mrf.mxu1  ;;  %v654_v33 = vadd.f32 %v1291_v26, %v1814_v17 }
  0xe3   : > { %v660_v41 = vadd.f32 %v1303_v30, %v1818_v19  ;;  %v1320_v30 = vunpack.c.h.bf16 %v1851_v51 }
  0xe4   : > { %v686_v44 = vmul.f32 0.2, %v654_v33  ;;  %vm670_vm1 = vcmp.ge.f32.partialorder %v654_v33, 0.0 }
  0xe5   : > { %vm676_vm2 = vcmp.ge.f32.partialorder %v660_v41, 0.0  ;;  %v692_v57 = vmul.f32 0.2, %v660_v41 }
  0xe6   : > { %v1855_v59 = vsel %vm670_vm1, %v654_v33, %v686_v44 }
  0xe7   : > { %v1816_v18 = vpop.f32.mrf.mxu3  ;;  %v1863_v5 = vsel %vm676_vm2, %v660_v41, %v692_v57 }
  0xe8   : > { %v664_v56 = vadd.f32 %v1311_v40, %v1816_v18 }
  0xe9   : > { %v1820_v20 = vpop.f32.mrf.mxu0 }
  0xea   : > { %v1826_v23 = vpop.f32.mrf.mxu1  ;;  %v655_v45 = vadd.f32 %v1292_v35, %v1820_v20  ;;  %vm680_vm6 = vcmp.ge.f32.partialorder %v664_v56, 0.0  ;;  %v696_v8 = vmul.f32 0.2, %v664_v56 }
  0xeb   : > { %v661_v48 = vadd.f32 %v1304_v37, %v1826_v23 }
  0xec   : > { %v687_v60 = vmul.f32 0.2, %v655_v45  ;;  %vm671_vm3 = vcmp.ge.f32.partialorder %v655_v45, 0.0 }
  0xed   : > { %v693_v0 = vmul.f32 0.2, %v661_v48  ;;  %vm677_vm5 = vcmp.ge.f32.partialorder %v661_v48, 0.0 }
  0xee   : > { %v1868_v9 = vsel %vm671_vm3, %v655_v45, %v687_v60 }
  0xef   : > { %v1822_v21 = vpop.f32.mrf.mxu3  ;;  %v1873_v13 = vsel %vm677_vm5, %v661_v48, %v693_v0 }
  0xf0   : > { %v665_v6 = vadd.f32 %v1312_v52, %v1822_v21 }
  0xf1   : > { %v1824_v22 = vpop.f32.mrf.mxu0 }
  0xf2   : > { %v1835_v31 = vpop.f32.mrf.mxu1  ;;  %v656_v47 = vadd.f32 %v1295_v36, %v1824_v22  ;;  %vm681_vm9 = vcmp.ge.f32.partialorder %v665_v6, 0.0  ;;  %v697_v35 = vmul.f32 0.2, %v665_v6 }
  0xf3   : > { %v662_v1 = vadd.f32 %v1307_v49, %v1835_v31 }
  0xf4   : > { %v688_v63 = vmul.f32 0.2, %v656_v47  ;;  %vm672_vm4 = vcmp.ge.f32.partialorder %v656_v47, 0.0  ;;  %v713_v51 = vsel %vm681_vm9, %v665_v6, %v697_v35 }
  0xf5   : > { %v694_v14 = vmul.f32 0.2, %v662_v1  ;;  %vm678_vm10 = vcmp.ge.f32.partialorder %v662_v1, 0.0 }
  0xf6   : > { %v1871_v12 = vsel %vm672_vm4, %v656_v47, %v688_v63 }
  0xf7   : > { %v1829_v25 = vpop.f32.mrf.mxu3  ;;  %v721_v36 = vmax.f32 %v1871_v12, %v1863_v5  ;;  %v1890_v38 = vsel %vm678_vm10, %v662_v1, %v694_v14 }
  0xf8   : > { %v666_v29 = vadd.f32 %v1315_v53, %v1829_v25 }
  0xf9   : > { %v1832_v28 = vpop.f32.mrf.mxu0 }
  0xfa   : > { %v657_v61 = vadd.f32 %v1296_v46, %v1832_v28  ;;  %v1860_v2 = vpop.f32.mrf.mxu1  ;;  %v712_v46 = vsel %vm680_vm6, %v664_v56, %v696_v8  ;;  %v698_v47 = vmul.f32 0.2, %v666_v29  ;;  %vm682_vm15 = vcmp.ge.f32.partialorder %v666_v29, 0.0 }
  0xfb   : > { %v663_v11 = vadd.f32 %v1308_v58, %v1860_v2  ;;  %v725_v58 = vmax.f32 %v721_v36, %v712_v46 }
  0xfc   : > { %v689_v10 = vmul.f32 0.2, %v657_v61  ;;  %vm673_vm8 = vcmp.ge.f32.partialorder %v657_v61, 0.0  ;;  %v714_v56 = vsel %vm682_vm15, %v666_v29, %v698_v47  ;;  %v801_v29 = vpack.c.bf16 %v1818_v19, %v1818_v19 }
  0xfd   : > { %v695_v33 = vmul.f32 0.2, %v663_v11  ;;  %vm679_vm12 = vcmp.ge.f32.partialorder %v663_v11, 0.0 }
  0xfe   : > { %v1884_v32 = vsel %vm673_vm8, %v657_v61, %v689_v10 }
  0xff   : > { %v1843_v43 = vpop.f32.mrf.mxu3  ;;  %v722_v42 = vmax.f32 %v1884_v32, %v1873_v13  ;;  %v1901_v48 = vsel %vm679_vm12, %v663_v11, %v695_v33 }
 0x100   : > { %v667_v16 = vadd.f32 %v1316_v54, %v1843_v43 }
 0x101   : > { %v1848_v50 = vpop.f32.mrf.mxu0  ;;  %v726_v61 = vmax.f32 %v722_v42, %v713_v51  ;;  %v806_v42 = vpack.c.bf16 %v1822_v21, %v1822_v21 }
 0x102   : > { %v658_v55 = vadd.f32 %v1299_v39, %v1848_v50  ;;  %v699_v39 = vmul.f32 0.2, %v667_v16  ;;  %vm683_vm13 = vcmp.ge.f32.partialorder %v667_v16, 0.0 }
 0x104   : > { %v690_v3 = vmul.f32 0.2, %v658_v55  ;;  %vm674_vm7 = vcmp.ge.f32.partialorder %v658_v55, 0.0  ;;  %v715_v54 = vsel %vm683_vm13, %v667_v16, %v699_v39  ;;  %v1907_v16 = vld [vmem:[#allocation4] sm:$0x1] }
 0x106   : > { %v1878_v24 = vsel %vm674_vm7, %v658_v55, %v690_v3 }
 0x107   : > { %v1866_v7 = vpop.f32.mrf.mxu3  ;;  %v719_v37 = vmax.f32 %v1855_v59, %v1878_v24 }
 0x108   : > { %v668_v26 = vadd.f32 %v1319_v62, %v1866_v7 }
 0x109   : > { %v1875_v15 = vpop.f32.mrf.mxu0  ;;  %v723_v52 = vmax.f32 %v719_v37, %v1890_v38  ;;  %v1924_v37 = vunpack.c.l.bf16 %v801_v29 }
 0x10a   : > { %v659_v27 = vadd.f32 %v1300_v4, %v1875_v15  ;;  %v700_v40 = vmul.f32 0.2, %v668_v26  ;;  %vm684_vm14 = vcmp.ge.f32.partialorder %v668_v26, 0.0 }
 0x10b   : > { %v727_v63 = vmax.f32 %v723_v52, %v714_v56 }
 0x10c   : > { %vm675_vm11 = vcmp.ge.f32.partialorder %v659_v27, 0.0  ;;  %v691_v34 = vmul.f32 0.2, %v659_v27  ;;  %v716_v55 = vsel %vm684_vm14, %v668_v26, %v700_v40 }
 0x10d   : > { %v729_v0 = vmax.f32 %v725_v58, %v716_v55  ;;  %v807_v58 = vpack.c.bf16 %v1829_v25, %v1829_v25 }
 0x10e   : > { %v1892_v41 = vsel %vm675_vm11, %v659_v27, %v691_v34 }
 0x10f   : > { %v720_v44 = vmax.f32 %v1868_v9, %v1892_v41  ;;  %v1898_v45 = vpop.f32.mrf.mxu3 }
 0x110   : > { %v669_v49 = vadd.f32 %v1320_v30, %v1898_v45  ;;  %v805_v30 = vpack.c.bf16 %v1816_v18, %v1816_v18 }
 0x111   : > { %v724_v53 = vmax.f32 %v720_v44, %v1901_v48  ;;  %v802_v44 = vpack.c.bf16 %v1826_v23, %v1826_v23 }
 0x112   : > { %vm685_vm0 = vcmp.ge.f32.partialorder %v669_v49, 0.0  ;;  %v701_v57 = vmul.f32 0.2, %v669_v49  ;;  %v1922_v36 = vunpack.c.l.bf16 %v805_v30 }
 0x113   : > { %v728_v60 = vmax.f32 %v724_v53, %v715_v54 }
 0x114   : > { %v717_v62 = vsel %vm685_vm0, %v669_v49, %v701_v57 }
 0x115   : > { %v730_v1 = vmax.f32 %v726_v61, %v717_v62  ;;  %v731_v3 = vmax.f32 %v727_v63, %v728_v60  ;;  %v809_v61 = vpack.c.bf16 %v1866_v7, %v1866_v7 }
 0x117   : > { %v732_v4 = vmax.f32 %v729_v0, %v730_v1  ;;  %v862_v0 = vunpack.c.l.bf16 %v807_v58 }
 0x119   : > { %v733_v6 = vmax.f32 %v731_v3, %v732_v4  ;;  %v864_v4 = vunpack.c.l.bf16 %v809_v61 }
 0x11b   : > { %v734_v8 = vrot.slane %v733_v6, 4 }
 0x11d   : > { %v735_v10 = vmax.f32 %v733_v6, %v734_v8 }
 0x11f   : > { %v736_v11 = vrot.slane %v735_v10, 2 }
 0x121   : > { %v737_v14 = vmax.f32 %v735_v10, %v736_v11 }
 0x123   : > { %v738_v27 = vrot.slane %v737_v14, 1 }
 0x125   : > { %v739_v26 = vmax.f32 %v737_v14, %v738_v27 }
 0x127   : > { %v1914_v33 = vmax.f32 %v1907_v16, %v739_v26 }
 0x129   : > { %v1917_v34 = vperm.slane %v1914_v33, 0  ;;  %984 = vst [vmem:[#allocation4] sm:$0x1] %v1914_v33  ;;  %v741_v35 = vsub.f32 %v1907_v16, %v1914_v33 }
 0x12b   : > { %v762_v18 = vsub.f32 %v717_v62, %v1917_v34  ;;  %v761_v39 = vsub.f32 %v716_v55, %v1917_v34  ;;  %v759_v19 = vsub.f32 %v714_v56, %v1917_v34  ;;  %v760_v40 = vsub.f32 %v715_v54, %v1917_v34 }
 0x12c   : > { %v757_v47 = vsub.f32 %v712_v46, %v1917_v34  ;;  %v758_v49 = vsub.f32 %v713_v51, %v1917_v34  ;;  %v755_v55 = vsub.f32 %v1890_v38, %v1917_v34  ;;  %v803_v54 = vpack.c.bf16 %v1835_v31, %v1835_v31 }
 0x12d   : > { %v793_v52 = vmul.f32 1.442695, %v762_v18  ;;  %v791_v53 = vmul.f32 1.442695, %v761_v39  ;;  %v787_v57 = vmul.f32 1.442695, %v759_v19  ;;  %v756_v23 = vsub.f32 %v1901_v48, %v1917_v34 }
 0x12e   : > { %v789_v21 = vmul.f32 1.442695, %v760_v40  ;;  %v804_v46 = vpack.c.bf16 %v1860_v2, %v1860_v2  ;;  %v783_v51 = vmul.f32 1.442695, %v757_v47  ;;  %v753_v60 = vsub.f32 %v1863_v5, %v1917_v34 }
 0x12f   : > { %1447 = vpow2.f32 %v793_v52  ;;  %v808_v38 = vpack.c.bf16 %v1843_v43, %v1843_v43  ;;  %v785_v25 = vmul.f32 1.442695, %v758_v49  ;;  %v754_v31 = vsub.f32 %v1873_v13, %v1917_v34 }
 0x130   : > { %1449 = vpow2.f32 %v791_v53  ;;  %v810_v48 = vpack.c.bf16 %v1898_v45, %v1898_v45  ;;  %v779_v2 = vmul.f32 1.442695, %v755_v55  ;;  %v1956_v56 = vunpack.c.l.bf16 %v806_v42 }
 0x131   : > { %1451 = vpow2.f32 %v787_v57  ;;  %v1958_v62 = vunpack.c.l.bf16 %v802_v44  ;;  %v781_v5 = vmul.f32 1.442695, %v756_v23  ;;  %v1960_v43 = vunpack.c.l.bf16 %v803_v54 }
 0x132   : > { %1453 = vpow2.f32 %v789_v21  ;;  %v775_v63 = vmul.f32 1.442695, %v753_v60  ;;  %v751_v13 = vsub.f32 %v1878_v24, %v1917_v34  ;;  %v1964_v7 = vunpack.c.l.bf16 %v804_v46 }
 0x133   : > { %1455 = vpow2.f32 %v783_v51  ;;  %v777_v45 = vmul.f32 1.442695, %v754_v31  ;;  %v863_v3 = vunpack.c.l.bf16 %v808_v38  ;;  %v865_v6 = vunpack.c.l.bf16 %v810_v48 }
 0x134   : > { %1457 = vpow2.f32 %v785_v25  ;;  %v752_v11 = vsub.f32 %v1892_v41, %v1917_v34  ;;  %v749_v14 = vsub.f32 %v1871_v12, %v1917_v34  ;;  %v771_v26 = vmul.f32 1.442695, %v751_v13 }
 0x135   : > { %v1448_v1 = vpop.eup %1447  ;;  %1459 = vpow2.f32 %v779_v2  ;;  %v750_v30 = vsub.f32 %v1884_v32, %v1917_v34  ;;  %v747_v41 = vsub.f32 %v1855_v59, %v1917_v34  ;;  %v748_v13 = vsub.f32 %v1868_v9, %v1917_v34 }
 0x136   : > { %v1450_v8 = vpop.eup %1449  ;;  %v826_v10 = vpack.c.bf16 %v1448_v1, %v1448_v1  ;;  %1461 = vpow2.f32 %v781_v5  ;;  %v773_v61 = vmul.f32 1.442695, %v752_v11 }
 0x137   : > { %v1452_v24 = vpop.eup %1451  ;;  %v825_v27 = vpack.c.bf16 %v1450_v8, %v1450_v8  ;;  %1463 = vpow2.f32 %v775_v63  ;;  %v763_v9 = vmul.f32 1.442695, %v747_v41  ;;  %v800_v41 = vpack.c.bf16 %v1875_v15, %v1875_v15 }
 0x138   : > { %v1454_v29 = vpop.eup %1453  ;;  %v849_v18 = vunpack.c.l.bf16 %v826_v10  ;;  %v949_v39 = vunpack.c.l.b16 %v826_v10  ;;  %v823_v19 = vpack.c.bf16 %v1452_v24, %v1452_v24  ;;  %1465 = vpow2.f32 %v777_v45 }
 0x139   : > { %v1456_v40 = vpop.eup %1455  ;;  %v948_v42 = vunpack.c.l.b16 %v825_v27  ;;  %v848_v44 = vunpack.c.l.bf16 %v825_v27  ;;  %v824_v47 = vpack.c.bf16 %v1454_v29, %v1454_v29  ;;  %1467 = vpow2.f32 %v771_v26 }
 0x13a   : > { %v1458_v12 = vpop.eup %1457  ;;  %v881_v49 = vmul.f32 %v865_v6, %v849_v18  ;;  %v946_v52 = vunpack.c.l.b16 %v823_v19  ;;  %v846_v53 = vunpack.c.l.bf16 %v823_v19  ;;  %v821_v57 = vpack.c.bf16 %v1456_v40, %v1456_v40 }
 0x13b   : > { %v1460_v55 = vpop.eup %1459  ;;  %v957_v58 = vpack.c.b16 %v949_v39, %v948_v42  ;;  %v880_v32 = vmul.f32 %v864_v4, %v848_v44  ;;  %v947_v54 = vunpack.c.l.b16 %v824_v47  ;;  %v847_v21 = vunpack.c.l.bf16 %v824_v47 }
 0x13c   : > { %v1462_v23 = vpop.eup %1461  ;;  %v878_v46 = vmul.f32 %v862_v0, %v846_v53  ;;  %v822_v51 = vpack.c.bf16 %v1458_v12, %v1458_v12  ;;  %v844_v60 = vunpack.c.l.bf16 %v821_v57  ;;  %v819_v59 = vpack.c.bf16 %v1460_v55, %v1460_v55 }
 0x13d   : > { %v1464_v38 = vpop.eup %1463  ;;  %966 = vmatpush.bf16.msra.mxu2 %v957_v58  ;;  %v889_v25 = vpack.c.bf16 %v881_v49, %v880_v32  ;;  %v879_v31 = vmul.f32 %v863_v3, %v847_v21  ;;  %v820_v63 = vpack.c.bf16 %v1462_v23, %v1462_v23  ;;  %v956_v45 = vpack.c.b16 %v947_v54, %v946_v52 }
 0x13e   : > { %v1466_v48 = vpop.eup %1465  ;;  %v845_v2 = vunpack.c.l.bf16 %v822_v51  ;;  %v876_v5 = vmul.f32 %v1922_v36, %v844_v60  ;;  %v944_v0 = vunpack.c.l.b16 %v821_v57  ;;  %v945_v1 = vunpack.c.l.b16 %v822_v51 }
 0x13f   : > { %896 = vmatpush.bf16.msrb.mxu1 %v889_v25  ;;  %v817_v4 = vpack.c.bf16 %v1464_v38, %v1464_v38  ;;  %v888_v6 = vpack.c.bf16 %v879_v31, %v878_v46  ;;  %v767_v10 = vmul.f32 1.442695, %v749_v14  ;;  %v769_v3 = vmul.f32 1.442695, %v750_v30  ;;  %v1468_v36 = vpop.eup %1467 }
 0x140   : > { %v877_v8 = vmul.f32 %v1956_v56, %v845_v2  ;;  %v842_v11 = vunpack.c.l.bf16 %v819_v59  ;;  %v843_v24 = vunpack.c.l.bf16 %v820_v63  ;;  %v818_v27 = vpack.c.bf16 %v1466_v48, %v1466_v48 }
 0x141   : > { %967 = vmatpush.bf16.msra.mxu2 %v956_v45  ;;  %v840_v26 = vunpack.c.l.bf16 %v817_v4  ;;  %v942_v18 = vunpack.c.l.b16 %v819_v59  ;;  %1469 = vpow2.f32 %v773_v61  ;;  %v955_v34 = vpack.c.b16 %v945_v1, %v944_v0 }
 0x142   : > { %v887_v29 = vpack.c.bf16 %v877_v8, %v876_v5  ;;  %v943_v39 = vunpack.c.l.b16 %v820_v63  ;;  %v841_v19 = vunpack.c.l.bf16 %v818_v27  ;;  %1471 = vpow2.f32 %v767_v10 }
 0x143   : > { %897 = vmatpush.bf16.msrb.mxu1 %v888_v6  ;;  %v872_v40 = vmul.f32 %v1924_v37, %v840_v26  ;;  %v765_v56 = vmul.f32 1.442695, %v748_v13  ;;  %v874_v14 = vmul.f32 %v1960_v43, %v842_v11  ;;  %v875_v30 = vmul.f32 %v1964_v7, %v843_v24 }
 0x144   : > { %v873_v42 = vmul.f32 %v1958_v62, %v841_v19  ;;  %v815_v44 = vpack.c.bf16 %v1468_v36, %v1468_v36  ;;  %v799_v47 = vpack.c.bf16 %v1848_v50, %v1848_v50  ;;  %v940_v12 = vunpack.c.l.b16 %v817_v4 }
 0x145   : > { %968 = vmatpush.bf16.msra.mxu2 %v955_v34  ;;  %1473 = vpow2.f32 %v769_v3  ;;  %v954_v37 = vpack.c.b16 %v943_v39, %v942_v18  ;;  %v941_v49 = vunpack.c.l.b16 %v818_v27  ;;  %v797_v43 = vpack.c.bf16 %v1824_v22, %v1824_v22  ;;  %v1275_v34 = vld [vmem:[%s344_s22] sm:$0xff] }
 0x146   : > { %v885_v52 = vpack.c.bf16 %v873_v42, %v872_v40  ;;  %1475 = vpow2.f32 %v763_v9  ;;  %v886_v62 = vpack.c.bf16 %v875_v30, %v874_v14  ;;  %v838_v57 = vunpack.c.l.bf16 %v815_v44  ;;  %v914_v42 = vld [vmem:[#allocation3 + $0x8] sm:$0xff] }
 0x147   : > { %898 = vmatpush.bf16.msrb.mxu1 %v887_v29  ;;  %v1470_v53 = vpop.eup %1469  ;;  %1477 = vpow2.f32 %v765_v56  ;;  %v798_v15 = vpack.c.bf16 %v1832_v28, %v1832_v28  ;;  %v854_v55 = vunpack.c.l.bf16 %v799_v47  ;;  %v855_v58 = vunpack.c.l.bf16 %v800_v41  ;;  %v827_v56 = vld [vmem:[#allocation2] sm:$0xff] }
 0x148   : > { %v816_v7 = vpack.c.bf16 %v1470_v53, %v1470_v53  ;;  %v1472_v50 = vpop.eup %1471  ;;  %v938_v32 = vunpack.c.l.b16 %v815_v44  ;;  %v953_v54 = vpack.c.b16 %v941_v49, %v940_v12  ;;  %v795_v22 = vpack.c.bf16 %v1814_v17, %v1814_v17  ;;  %v828_v12 = vld [vmem:[#allocation2 + $0x8] sm:$0xff]  ;;  %v915_v53 = vld [vmem:[#allocation3] sm:$0xff] }
 0x149   : > { %969 = vmatpush.bf16.msra.mxu2 %v954_v37  ;;  %v813_v46 = vpack.c.bf16 %v1472_v50, %v1472_v50  ;;  %v796_v60 = vpack.c.bf16 %v1820_v20, %v1820_v20  ;;  %v852_v25 = vunpack.c.l.bf16 %v797_v43  ;;  %v870_v31 = vmul.f32 %v854_v55, %v838_v57 }
 0x14a   : > { %v939_v21 = vunpack.c.l.b16 %v816_v7  ;;  %v839_v23 = vunpack.c.l.bf16 %v816_v7  ;;  %v853_v48 = vunpack.c.l.bf16 %v798_v15  ;;  %v850_v17 = vunpack.c.l.bf16 %v795_v22 }
 0x14b   : > { %899 = vmatpush.bf16.msrb.mxu1 %v886_v62  ;;  %v1474_v51 = vpop.eup %1473  ;;  %v836_v5 = vunpack.c.l.bf16 %v813_v46  ;;  %v936_v13 = vunpack.c.l.b16 %v813_v46  ;;  %v851_v20 = vunpack.c.l.bf16 %v796_v60  ;;  %v742_v39 = vmul.f32 1.442695, %v741_v35 }
 0x14c   : > { %v1476_v38 = vpop.eup %1475  ;;  %v871_v28 = vmul.f32 %v855_v58, %v839_v23  ;;  %v814_v59 = vpack.c.bf16 %v1474_v51, %v1474_v51  ;;  %v952_v2 = vpack.c.b16 %v939_v21, %v938_v32 }
 0x14d   : > { %970 = vmatpush.bf16.msra.mxu2 %v953_v54  ;;  %v1478_v61 = vpop.eup %1477  ;;  %v811_v63 = vpack.c.bf16 %v1476_v38, %v1476_v38  ;;  %v868_v4 = vmul.f32 %v852_v25, %v836_v5  ;;  %1479 = vpow2.f32 %v742_v39 }
 0x14e   : > { %v937_v45 = vunpack.c.l.b16 %v814_v59  ;;  %v837_v0 = vunpack.c.l.bf16 %v814_v59  ;;  %v812_v1 = vpack.c.bf16 %v1478_v61, %v1478_v61  ;;  %v884_v8 = vpack.c.bf16 %v871_v28, %v870_v31 }
 0x14f   : > { %900 = vmatpush.bf16.msrb.mxu1 %v885_v52  ;;  %v834_v6 = vunpack.c.l.bf16 %v811_v63  ;;  %v934_v11 = vunpack.c.l.b16 %v811_v63 }
 0x150   : > { %v869_v10 = vmul.f32 %v853_v48, %v837_v0  ;;  %v835_v3 = vunpack.c.l.bf16 %v812_v1  ;;  %v951_v27 = vpack.c.b16 %v937_v45, %v936_v13  ;;  %v935_v36 = vunpack.c.l.b16 %v812_v1 }
 0x151   : > { %971 = vmatpush.bf16.msra.mxu2 %v952_v2  ;;  %v866_v24 = vmul.f32 %v850_v17, %v834_v6 }
 0x152   : > { %v883_v26 = vpack.c.bf16 %v869_v10, %v868_v4  ;;  %v867_v29 = vmul.f32 %v851_v20, %v835_v3  ;;  %v950_v9 = vpack.c.b16 %v935_v36, %v934_v11 }
 0x153   : > { %901 = vmatpush.bf16.msrb.mxu1 %v884_v8  ;;  %v1480_v19 = vpop.eup %1479 }
 0x154   : > { %v882_v18 = vpack.c.bf16 %v867_v29, %v866_v24  ;;  %v830_v40 = vperm.slane %v1480_v19, 0 }
 0x155   : > { %972 = vmatpush.bf16.msra.mxu2 %v951_v27 }
 0x156   : > { %v832_v14 = vmul.f32 %v830_v40, %v827_v56  ;;  %v916_v47 = vmul.f32 %v914_v42, %v830_v40  ;;  %v833_v49 = vmul.f32 %v830_v40, %v828_v12  ;;  %v917_v16 = vmul.f32 %v915_v53, %v830_v40 }
 0x157   : > { %902 = vmatpush.bf16.msrb.mxu1 %v883_v26 }
 0x159   : > { %973 = vmatpush.bf16.msra.mxu2 %v950_v9 }
 0x15b   : > { %903 = vmatpush.bf16.msrb.mxu1 %v882_v18 }
 0x15c   : > { %974 = vmatmul.bf16.vlgmr.msra.gmra.mxu2 %v1275_v34 }
 0x15e   : > { %904 = vmatmul.bf16.vlgmr.msrb.gmra.mxu1 %v1275_v34 }
 0x1db   : > { %v905_v30 = vpop.f32.mrf.mxu1 }
 0x1dc   : > { %v910_v44 = vadd.f32 %v905_v30, %v832_v14 }
 0x1de   : > { %912 = vst [vmem:[#allocation2] sm:$0xff] %v910_v44 }
 0x1df   : > { %v975_v41 = vpop.f32.mrf.mxu2 }
 0x1e0   : > { %v980_v37 = vadd.f32 %v975_v41, %v916_v47 }
 0x1e2   : > { %982 = vst [vmem:[#allocation3 + $0x8] sm:$0xff] %v980_v37 }
 0x1e3   : > { %v907_v52 = vpop.f32.mrf.mxu1 }
 0x1e4   : > { %v911_v43 = vadd.f32 %v907_v52, %v833_v49 }
 0x1e6   : > { %913 = vst [vmem:[#allocation2 + $0x8] sm:$0xff] %v911_v43  ;;  %988 = sbr.rel (%p1268_p12) target bundleno = 513 (0x201), region = 93 }
 0x1e7   : > { %v977_v33 = vpop.f32.mrf.mxu2 }
 0x1e8   : > { %v981_v35 = vadd.f32 %v977_v33, %v917_v16 }
 0x1ea   : > { %983 = vst [vmem:[#allocation3] sm:$0xff] %v981_v35 }
 0x1eb   : > { %v989_v62 = vld [vmem:[#allocation3 + $0x8] sm:$0xff]  ;;  %v999_v15 = vld [vmem:[#allocation2] sm:$0xff] }
 0x1ec   : > { %vm991_vm1 = vcmp.gt.f32.partialorder %v989_v62, 0.0  ;;  %v997_v54 = vld [vmem:[%s1791_s18] sm:$0xff]  ;;  %v998_v23 = vld [vmem:[%s1791_s18 + $0x8] sm:$0xff] }
 0x1ed   : > { %v993_v57 = vsel %vm991_vm1, %v989_v62, 1.0  ;;  %v1000_v55 = vld [vmem:[#allocation2 + $0x8] sm:$0xff] }
 0x1ee   : > { %1481 = vrcp.f32 %v993_v57 }
 0x1f1   : > { %v990_v7 = vld [vmem:[#allocation3] sm:$0xff] }
 0x1f2   : > { %vm992_vm2 = vcmp.gt.f32.partialorder %v990_v7, 0.0 }
 0x1f3   : > { %v994_v50 = vsel %vm992_vm2, %v990_v7, 1.0 }
 0x1f4   : > { %1483 = vrcp.f32 %v994_v50  ;;  %v1482_v58 = vpop.eup %1481 }
 0x1f5   : > { %v1001_v21 = vmul.f32 %v1482_v58, %v999_v15 }
 0x1f7   : > { %v1003_v51 = vsel %vm991_vm1, %v1001_v21, 0.0 }
 0x1f8   : > { %v1005_v22 = vadd.f32 %v1003_v51, %v997_v54 }
 0x1fa   : > { %v1484_v32 = vpop.eup %1483  ;;  %1007 = vst [vmem:[%s1791_s18] sm:$0xff] %v1005_v22 }
 0x1fb   : > { %v1002_v46 = vmul.f32 %v1484_v32, %v1000_v55 }
 0x1fd   : > { %v1004_v60 = vsel %vm992_vm2, %v1002_v46, 0.0 }
 0x1fe   : > { %v1006_v38 = vadd.f32 %v1004_v60, %v998_v23 }
 0x200   : > { %1008 = vst [vmem:[%s1791_s18 + $0x8] sm:$0xff] %v1006_v38 }
 0x201 PF: > { %s1288_s22 = sshll.u32 %s1595_s25, 4  ;;  %s2093_s26 = sld [smem:[#allocation20_spill]] }
 0x202   : > { %s1023_s10 = sshll.u32 %s1791_s18, 4  ;;  %s2095_s8 = sand.u32 1, %s1571_s19   ;;  %s1024_s10 = int_to_ptr.vmem [resolvable:$true] %s1023_s10 }
 0x203   : > { %s1010_s11 = scalar_lea.sflag [#allocation7], %s2095_s8 }
 0x207   : > { %s2094_s30 = smov %s2093_s26  ;;  %s1022_s28 = scalar_lea.hbm %s2093_s26, %s1288_s22 }
 0x208   : > { %s1025_s5 = sshll.u32 %s1022_s28, 4  ;;  %s1505_s25 = scalar_lea.hbm %s2094_s30, 32  ;;  %s1026_s5 = int_to_ptr.hbm [resolvable:$true] %s1025_s5 }
 0x209   : > { %s1499_s15 = sshra.s32 %s1026_s5, 4  ;;  %s1500_s15 = int_to_ptr.hbm [resolvable:$true] %s1499_s15 }
 0x20a   : > { %s1501_s13 = scalar_lea.hbm %s1500_s15, 16  ;;  %p1506_p2 = scmp.lt.s32.totalorder %s1500_s15, %s2094_s30 }
 0x20b   : > { %p1502_p13 = scmp.ne.s32.totalorder %s1500_s15, %s1501_s13  ;;  %p1507_p3 = scmp.lt.s32.totalorder %s1505_s25, %s1501_s13 }
 0x20d   : > { %p1503_p0 = pnand %p1502_p13, %p1731_p9  ;;  %p1508_p4 = por %p1507_p3, %p1506_p2 }
 0x20f   : > { %p1504_p1 = pneg %p1503_p0 }
 0x211   : > { %p1509_p5 = pnand %p1508_p4, %p1504_p1 }
 0x213   : > { %1512 = shalt.err (!%p1509_p5)
}
 0x214   : > { %s1615_s18 = smov 128   ;;  %s1616_s6 = smov 8  }
 0x215   : > { %1339 = dma.vmem_to_hbm [thread:$0]  (%p1731_p9), %s1024_s10, 256, %s1026_s5, %s1010_s11, %s1615_s18, %s1615_s18, %s1616_s6  }
 0x216 PF: > { %s2096_s9 = sld [smem:[#allocation9_spill]]  ;;  %p1345_p6 = scmp.ge.s32.totalorder %s1611_s29, 2 }
 0x218   : > { %p1342_p7 = pnand %p1345_p6, %p1739_p11 }
 0x21a   : > { %p1343_p8 = pneg %p1342_p7 }
 0x21c   : > { %s1040_s2 = sand.u32 1, %s2096_s9  }
 0x21d   : > { %s1041_s27 = scalar_lea.sflag [#allocation7], %s1040_s2 }
 0x21e   : > { %1562 = dma.done.wait (%p1343_p8), %s1041_s27, 256  }
 0x21f   : > { %1564 = vsyncadd (%p1343_p8), %s1041_s27, 4294967040  ;;  %s18_s29 = sadd.s32 1, %s1611_s29   ;;  %s2097_s22 = sld [smem:[#allocation17_spill]] }
 0x220   : > { %p15_p10 = scmp.ge.s32.totalorder %s18_s29, 20   ;;  %s2098_s21 = sld [smem:[#allocation10_spill]] }
 0x221   : > { %s2099_s12 = sld [smem:[#allocation18_spill]]  ;;  %s2106_s18 = smov %s1571_s19 }
 0x222   : > { %s2100_s23 = sld [smem:[#allocation11_spill]]  ;;  %s2107_s19 = smov %s1575_s20 }
 0x223   : > { %s2101_s24 = sld [smem:[#allocation12_spill]]  ;;  %17 = sbr.rel (!%p15_p10) target bundleno = 10 (0xa), region = 145 }
 0x224   : > { %s2102_s25 = sld [smem:[#allocation13_spill]] }
 0x225   : > { %s2103_s26 = sld [smem:[#allocation14_spill]]  ;;  %s2108_s20 = smov %s2097_s22 }
 0x226   : > { %s2104_s27 = sld [smem:[#allocation15_spill]] }
 0x227   : > { %s2105_s28 = sld [smem:[#allocation16_spill]]  ;;  %s2109_s22 = smov %s2099_s12 }
 0x228   :  { %1047 = vsyncpa [#allocation7], 1 }
 0x229   :  { %1049 = vsyncpa [#allocation7 + $0x1], 1 }

</bundles_post_ra>
